<compile_context>
chip_gen: v5e
topology: v5e:2x2
jax: 0.10.0
libtpu: 0.0.40
codegen_flags: <defaults>
</compile_context>

<pallas_src>
import functools

import jax
import jax.numpy as jnp
from jax.experimental import pallas as pl
from jax.experimental.pallas import tpu as pltpu


def _noise_style_kernel(x_ref, mu_n_ref, sig_n_ref, o_ref, *, eps):
    # x_ref: (row_tile, HW); mu_n_ref / sig_n_ref: (row_tile, 1).
    x = x_ref[...].astype(jnp.float32)
    hw = x.shape[-1]

    # Per-row mean over the spatial positions (block carries the true HW).
    mu = jnp.sum(x, axis=-1, keepdims=True) * jnp.float32(1.0 / hw)

    # Unbiased variance (PyTorch Tensor.var default: correction=1).  `diff`
    # is only live across this reduction; it is not reused in the output pass.
    diff = x - mu
    if hw > 1:
        var = jnp.sum(diff * diff, axis=-1, keepdims=True) * jnp.float32(
            1.0 / (hw - 1)
        )
    else:
        # Matches PyTorch ddof=1 on a single spatial element (0/0 -> NaN).
        var = jnp.full_like(mu, jnp.nan)
    sig = jnp.sqrt(var + jnp.float32(eps))

    mu_noise = mu_n_ref[...].astype(jnp.float32)
    sig_noise = sig_n_ref[...].astype(jnp.float32)

    # Fold everything into per-row (rows, 1) column math:
    #   out = (x - mu)/sig * (sig + sig_noise) + (mu + mu_noise)
    #       = x * scale + shift
    # with scale = (sig + sig_noise)/sig, shift = (mu + mu_noise) - mu*scale.
    # Exact division on the (rows, 1) column is cheap; the full-tile work is
    # a single vmul + vadd.
    scale = (sig + sig_noise) / sig
    shift = (mu + mu_noise) - mu * scale

    o_ref[...] = (x * scale + shift).astype(o_ref.dtype)


def _round_up(v, m):
    return ((v + m - 1) // m) * m


def _cdiv(a, b):
    return (a + b - 1) // b


def _vmem_capacity_bytes():
    try:
        return int(pltpu.get_tpu_info().vmem_capacity_bytes)
    except Exception:
        return 64 << 20  # conservative (v7x-sized) fallback


def _choose_row_tile(r_pad, hw, itemsize, target_bytes, min_steps):
    """Row tile: multiple of 8, ~target_bytes of input per tile, and at least
    `min_steps` reasonably balanced grid steps when there is enough work."""
    bytes_per_row = max(1, hw * itemsize)
    rt = max(8, (target_bytes // bytes_per_row) // 8 * 8)
    rt = min(rt, r_pad)
    steps = _cdiv(r_pad, rt)
    want = min(min_steps, r_pad // 8)  # each step gets >= 8 rows
    if steps < want:
        rt = _round_up(_cdiv(r_pad, want), 8)
    return rt


def noise_style_pallas(x, mu_noise, sig_noise, *, eps=1e-6):
    """x: (B, C, H, W); mu_noise/sig_noise: broadcastable to (B, C).
    Returns the re-styled tensor, shape/dtype of x."""
    B, C, H, W = x.shape
    R, HW = B * C, H * W

    x2 = x.reshape(R, HW)
    mu_n = mu_noise.reshape(R, 1).astype(jnp.float32)
    sig_n = sig_noise.reshape(R, 1).astype(jnp.float32)

    # No lane padding: the x block's last dim is the full HW.  Only pad rows
    # in the rare case R is not a multiple of 8 (keeps the (8,128) rule).
    r_pad = _round_up(R, 8)
    if r_pad != R:
        x2 = jnp.pad(x2, ((0, r_pad - R), (0, 0)))
        mu_n = jnp.pad(mu_n, ((0, r_pad - R), (0, 0)))
        sig_n = jnp.pad(sig_n, ((0, r_pad - R), (0, 0)))

    itemsize = jnp.dtype(x.dtype).itemsize
    vmem_cap = _vmem_capacity_bytes()
    small_vmem = vmem_cap <= (64 << 20)  # v7x-class part: 64 MiB VMEM, 2 TCs
    target_tile_bytes = (3 << 20) if small_vmem else (8 << 20)
    min_steps = 4 if small_vmem else 1  # keep both v7x TensorCores busy

    row_tile = _choose_row_tile(r_pad, HW, itemsize, target_tile_bytes, min_steps)
    grid = (_cdiv(r_pad, row_tile),)

    # Honest VMEM accounting: double-buffered in + out tiles (input dtype)
    # plus ~2 full f32 temporaries in the kernel body, plus slack.
    tile_in = row_tile * HW * itemsize
    tile_f32 = row_tile * HW * 4
    vmem_limit = 4 * tile_in + 2 * tile_f32 + (4 << 20)
    vmem_limit = int(min(vmem_limit, max(vmem_cap - (16 << 20), 16 << 20)))

    out2 = pl.pallas_call(
        functools.partial(_noise_style_kernel, eps=eps),
        out_shape=jax.ShapeDtypeStruct((r_pad, HW), x.dtype),
        grid_spec=pltpu.PrefetchScalarGridSpec(
            num_scalar_prefetch=0,
            grid=grid,
            in_specs=[
                pl.BlockSpec((row_tile, HW), lambda i: (i, 0)),
                pl.BlockSpec((row_tile, 1), lambda i: (i, 0)),
                pl.BlockSpec((row_tile, 1), lambda i: (i, 0)),
            ],
            out_specs=pl.BlockSpec((row_tile, HW), lambda i: (i, 0)),
        ),
        compiler_params=pltpu.CompilerParams(
            dimension_semantics=("parallel",),
            vmem_limit_bytes=vmem_limit,
        ),
    )(x2, mu_n, sig_n)

    if r_pad != R:
        out2 = out2[:R]
    return out2.reshape(B, C, H, W)


def noise_style_forward(x, key, *, p=1.0, alpha=0.1, eps=1e-6,
                        training=True, activated=True):
    """Full NoiseStyle.forward: noise sampling + Bernoulli(p) gate in JAX glue,
    normalization / re-styling hot path in the Pallas kernel.
    (alpha is stored-but-unused in the reference module; kept for parity.)"""
    del alpha
    if not training or not activated:
        return x
    k_gate, k_mu, k_sig = jax.random.split(key, 3)
    B, C, _, _ = x.shape

    # Normal(0.0, 0.1) samples for mu / sig perturbation.
    mu_noise = 0.1 * jax.random.normal(k_mu, (B, C), dtype=jnp.float32)
    sig_noise = 0.1 * jax.random.normal(k_sig, (B, C), dtype=jnp.float32)

    # random.random() > p -> skip; lax.cond avoids running the kernel and the
    # extra full-tensor select pass that jnp.where would add.
    apply = jax.random.uniform(k_gate, ()) <= p
    return jax.lax.cond(
        apply,
        lambda ops: noise_style_pallas(ops[0], ops[1], ops[2], eps=eps),
        lambda ops: ops[0],
        (x, mu_noise, sig_noise),
    )


def _reference(x, mu_noise, sig_noise, eps):
    B, C, _, _ = x.shape
    mu = jnp.mean(x, axis=(2, 3), keepdims=True)
    var = jnp.var(x, axis=(2, 3), keepdims=True, ddof=1)
    sig = jnp.sqrt(var + eps)
    x_normed = (x - mu) / sig
    mu_mix = mu + mu_noise.reshape(B, C, 1, 1)
    sig_mix = sig + sig_noise.reshape(B, C, 1, 1)
    return x_normed * sig_mix + mu_mix


if __name__ == "__main__":
    key = jax.random.PRNGKey(0)
    k_x, k_mu, k_sig, k_fwd, k_x2 = jax.random.split(key, 5)

    # Case 1: H*W a multiple of 128 (fully lane-dense blocks).
    B, C, H, W = 2, 4, 16, 16
    x = jax.random.normal(k_x, (B, C, H, W), dtype=jnp.float32)
    mu_noise = 0.1 * jax.random.normal(k_mu, (B, C), dtype=jnp.float32)
    sig_noise = 0.1 * jax.random.normal(k_sig, (B, C), dtype=jnp.float32)

    out = jax.block_until_ready(noise_style_pallas(x, mu_noise, sig_noise, eps=1e-6))
    ref = _reference(x, mu_noise, sig_noise, 1e-6)
    assert out.shape == x.shape and out.dtype == x.dtype
    assert jnp.allclose(out, ref, atol=1e-5, rtol=1e-5)

    # Case 2: H*W not a multiple of 128 -> full-array-dim block, no padding.
    H2, W2 = 14, 14
    x_b = jax.random.normal(k_x2, (B, C, H2, W2), dtype=jnp.float32)
    out_b = jax.block_until_ready(noise_style_pallas(x_b, mu_noise, sig_noise, eps=1e-6))
    ref_b = _reference(x_b, mu_noise, sig_noise, 1e-6)
    assert out_b.shape == x_b.shape
    assert jnp.allclose(out_b, ref_b, atol=1e-5, rtol=1e-5)

    # Case 3: bf16 input exercises the dtype-aware tiling path.
    x_c = jax.random.normal(k_x2, (B, C, H, W), dtype=jnp.bfloat16)
    out_c = jax.block_until_ready(noise_style_pallas(x_c, mu_noise, sig_noise, eps=1e-6))
    ref_c = _reference(x_c.astype(jnp.float32), mu_noise, sig_noise, 1e-6)
    assert out_c.shape == x_c.shape and out_c.dtype == x_c.dtype
    assert jnp.allclose(out_c.astype(jnp.float32), ref_c, atol=3e-2, rtol=3e-2)

    # Full forward path (noise sampling + lax.cond gate), p = 1.0 -> applied.
    out_fwd = jax.block_until_ready(noise_style_forward(x, k_fwd, p=1.0, eps=1e-6))
    assert out_fwd.shape == x.shape and out_fwd.dtype == x.dtype
    assert bool(jnp.all(jnp.isfinite(out_fwd)))

    print("KERNEL_OK")
</pallas_src>

<mosaic_0001>
module attributes {stable_mosaic.version = 11 : i64} {
  func.func @_noise_style_kernel(%arg0: i32, %arg1: memref<8x256xf32, #tpu.memory_space<vmem>>, %arg2: memref<8x1xf32, #tpu.memory_space<vmem>>, %arg3: memref<8x1xf32, #tpu.memory_space<vmem>>, %arg4: memref<8x256xf32, #tpu.memory_space<vmem>>) attributes {dimension_semantics = [#tpu.dimension_semantics<parallel>], iteration_bounds = array<i64: 1>, scalar_prefetch = 0 : i64, scratch_operands = 0 : i64, tpu.core_type = #tpu.core_type<tc>, window_params = [{transform_indices = @transform_0, window_bounds = array<i64: 8, 256>}, {transform_indices = @transform_1, window_bounds = array<i64: 8, 1>}, {transform_indices = @transform_2, window_bounds = array<i64: 8, 1>}, {transform_indices = @transform_3, window_bounds = array<i64: 8, 256>}]} {
    %c0 = arith.constant 0 : index
    %c0_0 = arith.constant 0 : index
    %0 = vector.load %arg1[%c0, %c0_0] : memref<8x256xf32, #tpu.memory_space<vmem>>, vector<8x256xf32>
    %cst = arith.constant dense<0.000000e+00> : vector<8xf32>
    %1 = vector.multi_reduction <add>, %0, %cst [1] : vector<8x256xf32> to vector<8xf32>
    %2 = vector.shape_cast %1 : vector<8xf32> to vector<8x1xf32>
    %cst_1 = arith.constant 3.906250e-03 : f32
    %3 = vector.broadcast %cst_1 : f32 to vector<8x1xf32>
    %4 = arith.mulf %2, %3 : vector<8x1xf32>
    %5 = vector.broadcast %4 : vector<8x1xf32> to vector<8x256xf32>
    %6 = arith.subf %0, %5 : vector<8x256xf32>
    %7 = arith.mulf %6, %6 : vector<8x256xf32>
    %cst_2 = arith.constant dense<0.000000e+00> : vector<8xf32>
    %8 = vector.multi_reduction <add>, %7, %cst_2 [1] : vector<8x256xf32> to vector<8xf32>
    %9 = vector.shape_cast %8 : vector<8xf32> to vector<8x1xf32>
    %cst_3 = arith.constant 0.00392156886 : f32
    %10 = vector.broadcast %cst_3 : f32 to vector<8x1xf32>
    %11 = arith.mulf %9, %10 : vector<8x1xf32>
    %cst_4 = arith.constant 9.99999997E-7 : f32
    %12 = vector.broadcast %cst_4 : f32 to vector<8x1xf32>
    %13 = arith.addf %11, %12 : vector<8x1xf32>
    %14 = math.sqrt %13 : vector<8x1xf32>
    %c0_5 = arith.constant 0 : index
    %c0_6 = arith.constant 0 : index
    %15 = vector.load %arg2[%c0_5, %c0_6] : memref<8x1xf32, #tpu.memory_space<vmem>>, vector<8x1xf32>
    %c0_7 = arith.constant 0 : index
    %c0_8 = arith.constant 0 : index
    %16 = vector.load %arg3[%c0_7, %c0_8] : memref<8x1xf32, #tpu.memory_space<vmem>>, vector<8x1xf32>
    %17 = arith.addf %14, %16 : vector<8x1xf32>
    %18 = arith.divf %17, %14 : vector<8x1xf32>
    %19 = arith.addf %4, %15 : vector<8x1xf32>
    %20 = arith.mulf %4, %18 : vector<8x1xf32>
    %21 = arith.subf %19, %20 : vector<8x1xf32>
    %22 = vector.broadcast %18 : vector<8x1xf32> to vector<8x256xf32>
    %23 = arith.mulf %0, %22 : vector<8x256xf32>
    %24 = vector.broadcast %21 : vector<8x1xf32> to vector<8x256xf32>
    %25 = arith.addf %23, %24 : vector<8x256xf32>
    %c0_9 = arith.constant 0 : index
    %c0_10 = arith.constant 0 : index
    %26 = vector.load %arg4[%c0_9, %c0_10] : memref<8x256xf32, #tpu.memory_space<vmem>>, vector<8x256xf32>
    tpu.vector_store %arg4[%c0_9, %c0_10], %25 {strides = array<i32>} : memref<8x256xf32, #tpu.memory_space<vmem>>, vector<8x256xf32>,
    return
  }
  func.func @transform_0(%arg0: i32) -> (i32, i32) {
    %c0_i32 = arith.constant 0 : i32
    %c0_i32_0 = arith.constant 0 : i32
    return %arg0, %c0_i32 : i32, i32
  }
  func.func @transform_1(%arg0: i32) -> (i32, i32) {
    %c0_i32 = arith.constant 0 : i32
    %c0_i32_0 = arith.constant 0 : i32
    return %arg0, %c0_i32 : i32, i32
  }
  func.func @transform_2(%arg0: i32) -> (i32, i32) {
    %c0_i32 = arith.constant 0 : i32
    %c0_i32_0 = arith.constant 0 : i32
    return %arg0, %c0_i32 : i32, i32
  }
  func.func @transform_3(%arg0: i32) -> (i32, i32) {
    %c0_i32 = arith.constant 0 : i32
    %c0_i32_0 = arith.constant 0 : i32
    return %arg0, %c0_i32 : i32, i32
  }
}

</mosaic_0001>

<bundles_post_ra>
// kernel: tpu_custom_call.1
= control target key start
LH: loop header
LB: loop body
LE: loop exit
PB: predicated region body
PF: predicated region fallthrough
CT: control target
= control target key end

     0   :  { %s166_s0 = inlined_call_operand.vmem [shape: f32[8,256], index: 0, kind: input, shape index: {}]   ;;  %s167_s1 = inlined_call_operand.vmem [shape: f32[8,1], index: 1, kind: input, shape index: {}]   ;;  %s168_s2 = inlined_call_operand.vmem [shape: f32[8,1], index: 2, kind: input, shape index: {}]   ;;  %s169_s3 = inlined_call_operand.hbm [shape: f32[8,256], index: 3, kind: output, shape index: {}]  }
   0x1   :  { %v15_v0 = vld [vmem:[%s166_s0] sm:$0xff]  ;;  %v16_v1 = vld [vmem:[%s166_s0 + $0x8] sm:$0xff] }
   0x2   :  { %8 = vsyncpa [#allocation3], 0  ;;  %v17_v2 = vadd.f32 %v16_v1, %v15_v0  ;;  %v129_v10 = vmov 0   ;;  %v43_v30 = vld [vmem:[%s168_s2] sm:$0xff]  ;;  %s130_s2 = smov [#allocation2]   ;;  %s86_s22 = sshll.u32 %s169_s3, 4  ;;  %s87_s22 = int_to_ptr.hbm [resolvable:$true] %s86_s22 }
   0x3   :  { %97 = vset.pattern.permute.xlu1 %v129_v10  ;;  %98 = vset.pattern.permute.xlu0 %v129_v10  ;;  %v42_v37 = vld [vmem:[%s167_s1] sm:$0xff]  ;;  %s84_s19 = sshll.u32 %s130_s2, 4  ;;  %s85_s19 = int_to_ptr.vmem [resolvable:$true] %s84_s19 }
   0x4   :  { %18 = vadd.xlane.f32.xlu0 %v17_v2 }
  0x77   :  { %v19_v3 = vpop.xlane.xlu0 %18 }
  0x78   :  { %v20_v4 = vmul.f32 0.00390625, %v19_v3 }
  0x7a   :  { %v21_v5 = vsub.f32 %v15_v0, %v20_v4  ;;  %v22_v6 = vsub.f32 %v16_v1, %v20_v4  ;;  %v60_v39 = vadd.f32 %v42_v37, %v20_v4 }
  0x7c   :  { %v23_v7 = vmul.f32 %v21_v5, %v21_v5  ;;  %v24_v8 = vmul.f32 %v22_v6, %v22_v6 }
  0x7e   :  { %v25_v9 = vadd.f32 %v24_v8, %v23_v7 }
  0x80   :  { %26 = vadd.xlane.f32.xlu0 %v25_v9 }
  0xf3   :  { %v27_v11 = vpop.xlane.xlu0 %26 }
  0xf4   :  { %v28_v12 = vmul.f32 0.003921569, %v27_v11 }
  0xf6   :  { %v29_v13 = vadd.f32 1e-06, %v28_v12 }
  0xf8   :  { %99 = vrsqrt.f32 %v29_v13  ;;  %vm37_vm0 = vcmp.eq.f32.partialorder %v29_v13, inf  ;;  %v40_v21 = vand.u32 2147483648, %v29_v13  ;;  %vm39_vm1 = vcmp.eq.f32.partialorder %v29_v13, 0.0 }
  0xfe   :  { %v100_v14 = vpop.eup %99 }
  0xff   :  { %v31_v15 = vmul.f32 %v100_v14, %v29_v13 }
 0x101   :  { %v32_v16 = vmul.f32 %v100_v14, %v31_v15 }
 0x103   :  { %v33_v17 = vmul.f32 0.5, %v32_v16 }
 0x105   :  { %v34_v18 = vsub.f32 1.5, %v33_v17 }
 0x107   :  { %v35_v19 = vmul.f32 %v100_v14, %v34_v18 }
 0x109   :  { %v36_v20 = vmul.f32 %v35_v19, %v29_v13 }
 0x10b   :  { %v38_v22 = vsel %vm37_vm0, %v29_v13, %v36_v20 }
 0x10c   :  { %v41_v23 = vsel %vm39_vm1, %v40_v21, %v38_v22 }
 0x10d   :  { %101 = vrcp.f32 %v41_v23  ;;  %v56_v27 = vand.u32 2147483648, %v41_v23  ;;  %v54_v29 = vand.u32 2147483647, %v41_v23  ;;  %vm50_vm3 = vweird.f32 %v41_v23 }
 0x10e   :  { %v44_v33 = vadd.f32 %v43_v30, %v41_v23 }
 0x10f   :  { %v57_v32 = vor.u32 1.1754944e-38, %v56_v27  ;;  %vm55_vm5 = vcmp.eq.f32.partialorder %v54_v29, 8.507059e+37 }
 0x113   :  { %v102_v24 = vpop.eup %101 }
 0x114   :  { %v46_v25 = vmul.f32 %v102_v24, %v41_v23  ;;  %vm51_vm2 = vweird.f32 %v102_v24 }
 0x115   :  { %vm52_vm4 = vmor %vm50_vm3, %vm51_vm2 }
 0x116   :  { %v47_v26 = vsub.f32 1.0, %v46_v25 }
 0x118   :  { %v48_v28 = vmul.f32 %v102_v24, %v47_v26 }
 0x11a   :  { %v49_v31 = vadd.f32 %v102_v24, %v48_v28 }
 0x11c   :  { %v53_v34 = vsel %vm52_vm4, %v102_v24, %v49_v31 }
 0x11d   :  { %v58_v35 = vsel %vm55_vm5, %v57_v32, %v53_v34 }
 0x11e   :  { %v59_v36 = vmul.f32 %v58_v35, %v44_v33 }
 0x120   :  { %65 = vperm.xlu1 %97, %v59_v36   ;;  %v61_v38 = vmul.f32 %v59_v36, %v20_v4 }
 0x122   :  { %v62_v40 = vsub.f32 %v60_v39, %v61_v38 }
 0x128   :  { %72 = vperm.xlu1 %97, %v62_v40  }
 0x192   :  { %v66_v41 = vpop.permute.xlu1 %65 }
 0x193   :  { %v68_v42 = vmul.f32 %v66_v41, %v15_v0  ;;  %v69_v43 = vmul.f32 %v66_v41, %v16_v1 }
 0x19a   :  { %v73_v44 = vpop.permute.xlu1 %72 }
 0x19b   :  { %v75_v45 = vadd.f32 %v73_v44, %v68_v42  ;;  %v76_v46 = vadd.f32 %v73_v44, %v69_v43 }
 0x19d   :  { %77 = vst [vmem:[#allocation2] sm:$0xff] %v75_v45 }
 0x19e   :  { %78 = vst [vmem:[#allocation2 + $0x8] sm:$0xff] %v76_v46 }
 0x19f   :  { %89 = dma.vmem_to_hbm [thread:$0]  %s85_s19, 256, %s87_s22, [#allocation3]  }
 0x1a0   :  { %127 = dma.done.wait [#allocation3], 256  }
 0x1a1   :  { %128 = vsyncadd [#allocation3], 4294967040 }
 0x1a2   :  { %94 = vsyncpa [#allocation3], 1 }

</bundles_post_ra>
